<compile_context>
chip_gen: v5e
topology: v5e:2x2
jax: 0.10.0
libtpu: 0.0.40
codegen_flags: <defaults>
</compile_context>

<pallas_src>
import functools

import jax
import jax.numpy as jnp
from jax.experimental import pallas as pl
from jax.experimental.pallas import tpu as pltpu


def _leaky_relu(x, negative_slope=0.01):
    # max(x, a*x): mul+max (2 VALU ops) instead of cmp+select (3);
    # identical to F.leaky_relu for 0 < slope < 1.
    return jnp.maximum(x, negative_slope * x)


def _decoder_kernel(x_ref,
                    w1_ref, b1_ref,
                    w2_ref, b2_ref,
                    w3_ref, b3_ref,
                    w4_ref, b4_ref,
                    o_ref):
    """Fused 4-layer MLP: 3x (Linear + leaky_relu) + final Linear.

    Weights are (in, out) bf16; activations are carried between layers in bf16
    (next matmul needs bf16 anyway, halves vreg/VMEM pressure).  Accumulation
    and elementwise math (bias add, leaky_relu) stay in float32.
    """
    def layer(h_bf16, w_ref, b_ref):
        acc = jnp.dot(h_bf16, w_ref[...], preferred_element_type=jnp.float32)
        return acc + b_ref[...]                       # f32

    def act(h_f32):
        return _leaky_relu(h_f32).astype(jnp.bfloat16)

    h = x_ref[...].astype(jnp.bfloat16)               # (tm, in_f)   bf16
    h = act(layer(h, w1_ref, b1_ref))                 # (tm, 2*out)  bf16
    h = act(layer(h, w2_ref, b2_ref))                 # (tm, 2*out)  bf16
    h = act(layer(h, w3_ref, b3_ref))                 # (tm, 2*out)  bf16
    o_ref[...] = layer(h, w4_ref, b4_ref).astype(o_ref.dtype)   # (tm, out)


def init_decoder_params(key, input_size, output_size):
    """PyTorch nn.Linear-style init, then one-time prep for the kernel:
    weights transposed to (in, out) and cast to bf16, biases as (1, N) f32."""
    keys = jax.random.split(key, 4)

    def linear(k, in_f, out_f):
        kw, kb = jax.random.split(k)
        bound = 1.0 / (in_f ** 0.5)
        w = jax.random.uniform(kw, (out_f, in_f), jnp.float32, -bound, bound)
        b = jax.random.uniform(kb, (out_f,), jnp.float32, -bound, bound)
        # one-time prep (equivalent of load_pretrained_weights plumbing)
        return w.T.astype(jnp.bfloat16), b.reshape(1, -1)

    hid = 2 * output_size
    w1, b1 = linear(keys[0], input_size, hid)
    w2, b2 = linear(keys[1], hid, hid)
    w3, b3 = linear(keys[2], hid, hid)
    w4, b4 = linear(keys[3], hid, output_size)
    return dict(w1=w1, b1=b1, w2=w2, b2=b2, w3=w3, b3=b3, w4=w4, b4=b4)


def _round_up(v, m):
    return ((v + m - 1) // m) * m


@functools.partial(jax.jit, static_argnames=("tile_m", "out_dtype"))
def decoder_forward(x, params, tile_m=1024, out_dtype=jnp.float32):
    """x: (B, input_size) float32 -> (B, output_size) out_dtype."""
    B, in_f = x.shape
    hid = params["w2"].shape[0]
    out_f = params["w4"].shape[1]

    # Row tile selection:
    #  * big tiles (default up to 1024 rows) amortize the per-grid-step
    #    pipeline overhead and give the MXU long M runs,
    #  * capped at ceil(B/2) rounded to 8 sublanes so there are >=2 grid steps
    #    whenever B > 8, letting v7x shard steps across both TensorCores.
    tm = max(8, min(tile_m, _round_up(pl.cdiv(B, 2), 8)))
    Bp = _round_up(B, tm)
    if Bp != B:
        # Padded rows flow through all layers and are sliced off at the end.
        x = jnp.pad(x, ((0, Bp - B), (0, 0)))

    grid = (Bp // tm,)
    const = lambda i: (0, 0)   # weights/biases stay resident across grid steps

    out = pl.pallas_call(
        _decoder_kernel,
        out_shape=jax.ShapeDtypeStruct((Bp, out_f), out_dtype),
        grid=grid,
        in_specs=[
            pl.BlockSpec((tm, in_f), lambda i: (i, 0)),    # activations stream
            pl.BlockSpec((in_f, hid), const),
            pl.BlockSpec((1, hid), const),
            pl.BlockSpec((hid, hid), const),
            pl.BlockSpec((1, hid), const),
            pl.BlockSpec((hid, hid), const),
            pl.BlockSpec((1, hid), const),
            pl.BlockSpec((hid, out_f), const),
            pl.BlockSpec((1, out_f), const),
        ],
        out_specs=pl.BlockSpec((tm, out_f), lambda i: (i, 0)),
        compiler_params=pltpu.CompilerParams(
            dimension_semantics=("parallel",),
            # Explicit limit: v5e's default scoped VMEM is only 16 MiB.
            vmem_limit_bytes=32 * 1024 * 1024),
    )(x, params["w1"], params["b1"], params["w2"], params["b2"],
      params["w3"], params["b3"], params["w4"], params["b4"])

    return out[:B]


def decoder_reference(x, params):
    """Pure-JAX reference mirroring the kernel's numerics
    (bf16 operands + bf16 inter-layer carry, f32 accumulation/elementwise)."""
    def layer(h_bf16, w, b):
        return jnp.dot(h_bf16, w, preferred_element_type=jnp.float32) + b

    def act(h_f32):
        return _leaky_relu(h_f32).astype(jnp.bfloat16)

    h = x.astype(jnp.bfloat16)
    h = act(layer(h, params["w1"], params["b1"]))
    h = act(layer(h, params["w2"], params["b2"]))
    h = act(layer(h, params["w3"], params["b3"]))
    return layer(h, params["w4"], params["b4"])


if __name__ == "__main__":
    # NOTE: at tiny batch (B=16) the call is bound by launch + the one-time
    # ~0.36 MiB weight DMA, not compute; this run is a correctness check.
    # For repeated tiny-batch serving, keep weights resident across calls
    # (cross-pallas_call prefetch) or batch requests — in-kernel tiling cannot
    # help at M=16.
    input_size = 64
    output_size = 128
    B = 16

    key = jax.random.PRNGKey(0)
    kx, kp = jax.random.split(key)
    params = init_decoder_params(kp, input_size, output_size)
    x = jax.random.normal(kx, (B, input_size), jnp.float32)

    out = jax.block_until_ready(decoder_forward(x, params))

    ref = decoder_reference(x, params)
    assert out.shape == (B, output_size), out.shape
    assert jnp.allclose(out, ref, atol=2e-2, rtol=2e-2), float(
        jnp.max(jnp.abs(out - ref)))

    print("KERNEL_OK")
</pallas_src>

<mosaic_0001>
module attributes {stable_mosaic.version = 11 : i64} {
  func.func @_decoder_kernel(%arg0: i32, %arg1: memref<8x64xf32, #tpu.memory_space<vmem>>, %arg2: memref<64x256xbf16, #tpu.memory_space<vmem>>, %arg3: memref<1x256xf32, #tpu.memory_space<vmem>>, %arg4: memref<256x256xbf16, #tpu.memory_space<vmem>>, %arg5: memref<1x256xf32, #tpu.memory_space<vmem>>, %arg6: memref<256x256xbf16, #tpu.memory_space<vmem>>, %arg7: memref<1x256xf32, #tpu.memory_space<vmem>>, %arg8: memref<256x128xbf16, #tpu.memory_space<vmem>>, %arg9: memref<1x128xf32, #tpu.memory_space<vmem>>, %arg10: memref<8x128xf32, #tpu.memory_space<vmem>>) attributes {dimension_semantics = [#tpu.dimension_semantics<parallel>], iteration_bounds = array<i64: 2>, scalar_prefetch = 0 : i64, scratch_operands = 0 : i64, tpu.core_type = #tpu.core_type<tc>, window_params = [{transform_indices = @transform_0, window_bounds = array<i64: 8, 64>}, {pipeline_mode = #tpu.pipeline_mode<synchronous>, transform_indices = @transform_1, window_bounds = array<i64: 64, 256>}, {pipeline_mode = #tpu.pipeline_mode<synchronous>, transform_indices = @transform_2, window_bounds = array<i64: 1, 256>}, {pipeline_mode = #tpu.pipeline_mode<synchronous>, transform_indices = @transform_3, window_bounds = array<i64: 256, 256>}, {pipeline_mode = #tpu.pipeline_mode<synchronous>, transform_indices = @transform_4, window_bounds = array<i64: 1, 256>}, {pipeline_mode = #tpu.pipeline_mode<synchronous>, transform_indices = @transform_5, window_bounds = array<i64: 256, 256>}, {pipeline_mode = #tpu.pipeline_mode<synchronous>, transform_indices = @transform_6, window_bounds = array<i64: 1, 256>}, {pipeline_mode = #tpu.pipeline_mode<synchronous>, transform_indices = @transform_7, window_bounds = array<i64: 256, 128>}, {pipeline_mode = #tpu.pipeline_mode<synchronous>, transform_indices = @transform_8, window_bounds = array<i64: 1, 128>}, {transform_indices = @transform_9, window_bounds = array<i64: 8, 128>}]} {
    %c0 = arith.constant 0 : index
    %c0_0 = arith.constant 0 : index
    %0 = vector.load %arg1[%c0, %c0_0] : memref<8x64xf32, #tpu.memory_space<vmem>>, vector<8x64xf32>
    %1 = arith.truncf %0 : vector<8x64xf32> to vector<8x64xbf16>
    %c0_1 = arith.constant 0 : index
    %c0_2 = arith.constant 0 : index
    %2 = vector.load %arg2[%c0_1, %c0_2] : memref<64x256xbf16, #tpu.memory_space<vmem>>, vector<64x256xbf16>
    %cst = arith.constant dense<0.000000e+00> : vector<8x256xf32>
    %3 = tpu.matmul %1, %2, %cst {dimension_numbers = #tpu.dot_dimension_numbers<[1], [0], [0], [1], [0, 0, 1, 1], [], []>} : vector<8x64xbf16>, vector<64x256xbf16>, vector<8x256xf32> -> vector<8x256xf32>
    %c0_3 = arith.constant 0 : index
    %c0_4 = arith.constant 0 : index
    %4 = vector.load %arg3[%c0_3, %c0_4] : memref<1x256xf32, #tpu.memory_space<vmem>>, vector<1x256xf32>
    %5 = vector.broadcast %4 : vector<1x256xf32> to vector<8x256xf32>
    %6 = arith.addf %3, %5 : vector<8x256xf32>
    %cst_5 = arith.constant 0.00999999977 : f32
    %7 = vector.broadcast %cst_5 : f32 to vector<8x256xf32>
    %8 = arith.mulf %7, %6 : vector<8x256xf32>
    %9 = arith.maximumf %6, %8 : vector<8x256xf32>
    %10 = arith.truncf %9 : vector<8x256xf32> to vector<8x256xbf16>
    %c0_6 = arith.constant 0 : index
    %c0_7 = arith.constant 0 : index
    %11 = vector.load %arg4[%c0_6, %c0_7] : memref<256x256xbf16, #tpu.memory_space<vmem>>, vector<256x256xbf16>
    %cst_8 = arith.constant dense<0.000000e+00> : vector<8x256xf32>
    %12 = tpu.matmul %10, %11, %cst_8 {dimension_numbers = #tpu.dot_dimension_numbers<[1], [0], [0], [1], [0, 0, 1, 1], [], []>} : vector<8x256xbf16>, vector<256x256xbf16>, vector<8x256xf32> -> vector<8x256xf32>
    %c0_9 = arith.constant 0 : index
    %c0_10 = arith.constant 0 : index
    %13 = vector.load %arg5[%c0_9, %c0_10] : memref<1x256xf32, #tpu.memory_space<vmem>>, vector<1x256xf32>
    %14 = vector.broadcast %13 : vector<1x256xf32> to vector<8x256xf32>
    %15 = arith.addf %12, %14 : vector<8x256xf32>
    %cst_11 = arith.constant 0.00999999977 : f32
    %16 = vector.broadcast %cst_11 : f32 to vector<8x256xf32>
    %17 = arith.mulf %16, %15 : vector<8x256xf32>
    %18 = arith.maximumf %15, %17 : vector<8x256xf32>
    %19 = arith.truncf %18 : vector<8x256xf32> to vector<8x256xbf16>
    %c0_12 = arith.constant 0 : index
    %c0_13 = arith.constant 0 : index
    %20 = vector.load %arg6[%c0_12, %c0_13] : memref<256x256xbf16, #tpu.memory_space<vmem>>, vector<256x256xbf16>
    %cst_14 = arith.constant dense<0.000000e+00> : vector<8x256xf32>
    %21 = tpu.matmul %19, %20, %cst_14 {dimension_numbers = #tpu.dot_dimension_numbers<[1], [0], [0], [1], [0, 0, 1, 1], [], []>} : vector<8x256xbf16>, vector<256x256xbf16>, vector<8x256xf32> -> vector<8x256xf32>
    %c0_15 = arith.constant 0 : index
    %c0_16 = arith.constant 0 : index
    %22 = vector.load %arg7[%c0_15, %c0_16] : memref<1x256xf32, #tpu.memory_space<vmem>>, vector<1x256xf32>
    %23 = vector.broadcast %22 : vector<1x256xf32> to vector<8x256xf32>
    %24 = arith.addf %21, %23 : vector<8x256xf32>
    %cst_17 = arith.constant 0.00999999977 : f32
    %25 = vector.broadcast %cst_17 : f32 to vector<8x256xf32>
    %26 = arith.mulf %25, %24 : vector<8x256xf32>
    %27 = arith.maximumf %24, %26 : vector<8x256xf32>
    %28 = arith.truncf %27 : vector<8x256xf32> to vector<8x256xbf16>
    %c0_18 = arith.constant 0 : index
    %c0_19 = arith.constant 0 : index
    %29 = vector.load %arg8[%c0_18, %c0_19] : memref<256x128xbf16, #tpu.memory_space<vmem>>, vector<256x128xbf16>
    %cst_20 = arith.constant dense<0.000000e+00> : vector<8x128xf32>
    %30 = tpu.matmul %28, %29, %cst_20 {dimension_numbers = #tpu.dot_dimension_numbers<[1], [0], [0], [1], [0, 0, 1, 1], [], []>} : vector<8x256xbf16>, vector<256x128xbf16>, vector<8x128xf32> -> vector<8x128xf32>
    %c0_21 = arith.constant 0 : index
    %c0_22 = arith.constant 0 : index
    %31 = vector.load %arg9[%c0_21, %c0_22] : memref<1x128xf32, #tpu.memory_space<vmem>>, vector<1x128xf32>
    %32 = vector.broadcast %31 : vector<1x128xf32> to vector<8x128xf32>
    %33 = arith.addf %30, %32 : vector<8x128xf32>
    %c0_23 = arith.constant 0 : index
    %c0_24 = arith.constant 0 : index
    %34 = vector.load %arg10[%c0_23, %c0_24] : memref<8x128xf32, #tpu.memory_space<vmem>>, vector<8x128xf32>
    tpu.vector_store %arg10[%c0_23, %c0_24], %33 {strides = array<i32>} : memref<8x128xf32, #tpu.memory_space<vmem>>, vector<8x128xf32>,
    return
  }
  func.func @transform_0(%arg0: i32) -> (i32, i32) {
    %c0_i32 = arith.constant 0 : i32
    %c0_i32_0 = arith.constant 0 : i32
    return %arg0, %c0_i32 : i32, i32
  }
  func.func @transform_1(%arg0: i32) -> (i32, i32) {
    %c0_i32 = arith.constant 0 : i32
    %c0_i32_0 = arith.constant 0 : i32
    %c0_i32_1 = arith.constant 0 : i32
    return %c0_i32, %c0_i32_0 : i32, i32
  }
  func.func @transform_2(%arg0: i32) -> (i32, i32) {
    %c0_i32 = arith.constant 0 : i32
    %c0_i32_0 = arith.constant 0 : i32
    %c0_i32_1 = arith.constant 0 : i32
    return %c0_i32, %c0_i32_0 : i32, i32
  }
  func.func @transform_3(%arg0: i32) -> (i32, i32) {
    %c0_i32 = arith.constant 0 : i32
    %c0_i32_0 = arith.constant 0 : i32
    %c0_i32_1 = arith.constant 0 : i32
    return %c0_i32, %c0_i32_0 : i32, i32
  }
  func.func @transform_4(%arg0: i32) -> (i32, i32) {
    %c0_i32 = arith.constant 0 : i32
    %c0_i32_0 = arith.constant 0 : i32
    %c0_i32_1 = arith.constant 0 : i32
    return %c0_i32, %c0_i32_0 : i32, i32
  }
  func.func @transform_5(%arg0: i32) -> (i32, i32) {
    %c0_i32 = arith.constant 0 : i32
    %c0_i32_0 = arith.constant 0 : i32
    %c0_i32_1 = arith.constant 0 : i32
    return %c0_i32, %c0_i32_0 : i32, i32
  }
  func.func @transform_6(%arg0: i32) -> (i32, i32) {
    %c0_i32 = arith.constant 0 : i32
    %c0_i32_0 = arith.constant 0 : i32
    %c0_i32_1 = arith.constant 0 : i32
    return %c0_i32, %c0_i32_0 : i32, i32
  }
  func.func @transform_7(%arg0: i32) -> (i32, i32) {
    %c0_i32 = arith.constant 0 : i32
    %c0_i32_0 = arith.constant 0 : i32
    %c0_i32_1 = arith.constant 0 : i32
    return %c0_i32, %c0_i32_0 : i32, i32
  }
  func.func @transform_8(%arg0: i32) -> (i32, i32) {
    %c0_i32 = arith.constant 0 : i32
    %c0_i32_0 = arith.constant 0 : i32
    %c0_i32_1 = arith.constant 0 : i32
    return %c0_i32, %c0_i32_0 : i32, i32
  }
  func.func @transform_9(%arg0: i32) -> (i32, i32) {
    %c0_i32 = arith.constant 0 : i32
    %c0_i32_0 = arith.constant 0 : i32
    return %arg0, %c0_i32 : i32, i32
  }
}

</mosaic_0001>

<bundles_post_ra>
// kernel: decoder_forward.1
= control target key start
LH: loop header
LB: loop body
LE: loop exit
PB: predicated region body
PF: predicated region fallthrough
CT: control target
= control target key end

     0   :  { %s2476_s0 = inlined_call_operand.hbm [shape: f32[16,64], index: 0, kind: input, shape index: {}]   ;;  %s2477_s1 = inlined_call_operand.hbm [shape: bf16[64,256], index: 1, kind: input, shape index: {}]   ;;  %s2478_s2 = inlined_call_operand.hbm [shape: f32[1,256], index: 2, kind: input, shape index: {}]   ;;  %s2479_s3 = inlined_call_operand.hbm [shape: bf16[256,256], index: 3, kind: input, shape index: {}]   ;;  %s2480_s4 = inlined_call_operand.hbm [shape: f32[1,256], index: 4, kind: input, shape index: {}]   ;;  %s2481_s5 = inlined_call_operand.hbm [shape: bf16[256,256], index: 5, kind: input, shape index: {}]   ;;  %s2482_s6 = inlined_call_operand.vmem [shape: f32[1,256], index: 6, kind: input, shape index: {}]   ;;  %s2483_s7 = inlined_call_operand.hbm [shape: bf16[256,128], index: 7, kind: input, shape index: {}]   ;;  %s2484_s8 = inlined_call_operand.vmem [shape: f32[1,128], index: 8, kind: input, shape index: {}]   ;;  %s2485_s9 = inlined_call_operand.hbm [shape: f32[16,128], index: 9, kind: output, shape index: {}]  }
   0x1   :  { %2486 = sst [smem:[#allocation20_spill]] %s2477_s1 }
   0x2   :  { %2487 = sst [smem:[#allocation21_spill]] %s2478_s2 }
   0x3   :  { %2488 = sst [smem:[#allocation22_spill]] %s2479_s3 }
   0x4   :  { %2489 = sst [smem:[#allocation23_spill]] %s2480_s4 }
   0x5   :  { %14 = vsyncpa [#allocation3], 0 }
   0x6   :  { %16 = vsyncpa [#allocation3 + $0x1], 0 }
   0x7   :  { %17 = vsyncpa [#allocation6], 0 }
   0x8   :  { %18 = vsyncpa [#allocation9], 0 }
   0x9   :  { %19 = vsyncpa [#allocation12], 0 }
   0xa   :  { %20 = vsyncpa [#allocation4], 0 }
   0xb   :  { %22 = vsyncpa [#allocation4 + $0x1], 0  ;;  %s2280_s30 = smov 0   ;;  %s2282_s10 = smov 0  }
   0xc   :  { %s2284_s11 = smov 0   ;;  %s2286_s12 = smov 0  }
   0xd LB: > { %s2490_s1 = sld [smem:[#allocation20_spill]]  ;;  %s2304_s16 = sadd.s32 4294967295, %s2218_s12   ;;  %s2218_s12 = sphi %s2286_s12, %s2505_s12   ;;  %s2214_s11 = sphi %s2284_s11, %s2504_s11   ;;  %s2210_s10 = sphi %s2282_s10, %s2503_s10   ;;  %s2206_s30 = sphi %s2280_s30, %s2502_s30  }
   0xe   : > { %p1353_p0 = scmp.ge.s32.totalorder %s2218_s12, 1  ;;  %p49_p1 = scmp.eq.s32.totalorder %s2304_s16, 0 }
   0xf   : > { %p253_p2 = scmp.lt.s32.totalorder %s2218_s12, 3  ;;  %s2220_s18 = smov [#allocation5]  }
  0x10   : > { %s266_s19 = sshll.u32 %s2220_s18, 4  ;;  %s2492_s3 = sld [smem:[#allocation22_spill]]  ;;  %s267_s19 = int_to_ptr.vmem [resolvable:$true] %s266_s19 }
  0x11   : > { %p2309_p3 = pnand %p1353_p0, %p253_p2  ;;  %s316_s26 = sshll.u32 %s2481_s5, 4  ;;  %s317_s26 = int_to_ptr.hbm [resolvable:$true] %s316_s26 }
  0x12   : > { %s2221_s27 = smov [#allocation8]   ;;  %s2222_s29 = smov 128  }
  0x13   : > { %s264_s15 = sshll.u32 %s2490_s1, 4  ;;  %p1846_p4 = pneg %p2309_p3  ;;  %s265_s15 = int_to_ptr.hbm [resolvable:$true] %s264_s15 }
  0x14   : > { %s292_s28 = sshll.u32 %s2221_s27, 4  ;;  %s2223_s13 = smov 8   ;;  %s293_s28 = int_to_ptr.vmem [resolvable:$true] %s292_s28 }
  0x15   : > { %p2321_p6 = pnand %p1846_p4, %p49_p1  ;;  %s2494_s2 = sld [smem:[#allocation21_spill]] }
  0x16   : > { %s290_s22 = sshll.u32 %s2492_s3, 4  ;;  %s2224_s21 = smov [#allocation11]   ;;  %s291_s22 = int_to_ptr.hbm [resolvable:$true] %s290_s22 }
  0x17   : > { %1849 = dma.hbm_to_vmem [thread:$0]  (!%p2321_p6), %s265_s15, 1024, %s267_s19, [#allocation6], %s2222_s29, %s2222_s29, %s2223_s13  }
  0x18   : > { %1855 = dma.hbm_to_vmem [thread:$0]  (!%p2321_p6), %s291_s22, 4096, %s293_s28, [#allocation9], %s2222_s29, %s2222_s29, %s2223_s13  }
  0x19   : > { %s318_s1 = sshll.u32 %s2224_s21, 4  ;;  %s2225_s24 = smov [#allocation7]   ;;  %s319_s1 = int_to_ptr.vmem [resolvable:$true] %s318_s1 }
  0x1a   : > { %1861 = dma.hbm_to_vmem [thread:$0]  (!%p2321_p6), %s317_s26, 4096, %s319_s1, [#allocation12], %s2222_s29, %s2222_s29, %s2223_s13  }
  0x1b   : > { %s279_s20 = sshll.u32 %s2494_s2, 4  ;;  %s281_s25 = sshll.u32 %s2225_s24, 4  ;;  %s280_s20 = int_to_ptr.hbm [resolvable:$true] %s279_s20  ;;  %s282_s25 = int_to_ptr.vmem [resolvable:$true] %s281_s25 }
  0x1c   : > { %s2495_s4 = sld [smem:[#allocation23_spill]]  ;;  %s333_s28 = sshll.u32 %s2483_s7, 4  ;;  %s334_s28 = int_to_ptr.hbm [resolvable:$true] %s333_s28 }
  0x1d   : > { %1852 = dma.hbm_to_vmem [thread:$0]  (!%p2321_p6), %s280_s20, 32, %s282_s25, [#allocation6]  }
  0x1e   : > { %s2226_s1 = smov [#allocation10]   ;;  %s2227_s3 = smov [#allocation13]  }
  0x1f   : > { %s307_s26 = sshll.u32 %s2226_s1, 4  ;;  %s335_s29 = sshll.u32 %s2227_s3, 4  ;;  %s308_s26 = int_to_ptr.vmem [resolvable:$true] %s307_s26  ;;  %s336_s29 = int_to_ptr.vmem [resolvable:$true] %s335_s29 }
  0x20   : > { %s2228_s13 = smov 64   ;;  %s2229_s14 = smov 4  }
  0x21   : > { %1864 = dma.hbm_to_vmem [thread:$0]  (!%p2321_p6), %s334_s28, 2048, %s336_s29, [#allocation12], %s2228_s13, %s2228_s13, %s2229_s14  }
  0x22   : > { %s305_s15 = sshll.u32 %s2495_s4, 4  ;;  %s1352_s18 = sadd.s32 4294967294, %s2218_s12   ;;  %s306_s15 = int_to_ptr.hbm [resolvable:$true] %s305_s15 }
  0x23   : > { %1858 = dma.hbm_to_vmem [thread:$0]  (!%p2321_p6), %s306_s15, 32, %s308_s26, [#allocation9]  }
  0x24   : > { %s2351_s20 = sadd.s32 1, %s2218_s12   ;;  %s35_s24 = sadd.s32 1, %s2214_s11 }
  0x25   : > { %s32_s21 = ssub.s32 %s2218_s12, %s2351_s20  ;;  %p42_p8 = scmp.ne.s32.totalorder %s2214_s11, %s2210_s10 }
  0x26   : > { %p33_p7 = scmp.eq.s32.totalorder %s32_s21, 0  ;;  %p43_p9 = scmp.eq.s32.totalorder %s2218_s12, 0 }
  0x27   : > { %p48_p10 = scmp.ne.s32.totalorder %s2210_s10, %s2206_s30  ;;  %p240_p13 = scmp.eq.s32.totalorder %s2304_s16, 1 }
  0x28   : > { %s2362_s25 = scalar_select %p33_p7, %s2214_s11, %s35_s24  }
  0x29   : > { %p2364_p11 = por %p43_p9, %p42_p8  ;;  %p2370_p12 = por %p49_p1, %p48_p10 }
  0x2a   : > { %p246_p0 = scmp.eq.s32.totalorder %s1352_s18, 1  ;;  %p1879_p2 = scmp.lt.s32.totalorder %s2218_s12, 2 }
  0x2b   : > { %s352_s15 = sand.u32 1, %s2214_s11   ;;  %p2377_p4 = por %p240_p13, %p42_p8 }
  0x2c   : > { %p2381_p6 = por %p246_p0, %p48_p10  ;;  %s1361_s28 = sshll.u32 %s352_s15, 3 }
  0x2d   : > { %s1362_s1 = sshll.u32 %s2218_s12, 3  ;;  %s356_s13 = scalar_lea.vmem [#allocation2], %s1361_s28 }
  0x2e   : > { %s360_s29 = scalar_lea.hbm %s2476_s0, %s1362_s1  ;;  %s364_s14 = sshll.u32 %s356_s13, 4  ;;  %s365_s14 = int_to_ptr.vmem [resolvable:$true] %s364_s14 }
  0x2f   : > { %s362_s21 = sshll.u32 %s360_s29, 4  ;;  %p2391_p7 = pnand %p1879_p2, %p2364_p11  ;;  %s363_s21 = int_to_ptr.hbm [resolvable:$true] %s362_s21 }
  0x30   : > { %s353_s24 = scalar_lea.sflag [#allocation3], %s352_s15  ;;  %s2110_s2 = sshra.s32 %s363_s21, 4  ;;  %s2111_s2 = int_to_ptr.hbm [resolvable:$true] %s2110_s2 }
  0x31   : > { %s2112_s4 = scalar_lea.hbm %s2111_s2, 8  ;;  %p2114_p9 = pneg %p2391_p7 }
  0x32   : > { %p2113_p8 = scmp.ne.s32.totalorder %s2111_s2, %s2112_s4  ;;  %s2117_s26 = scalar_lea.hbm %s2476_s0, 16 }
  0x33   : > { %p2118_p11 = scmp.lt.s32.totalorder %s2111_s2, %s2476_s0  ;;  %p2119_p0 = scmp.lt.s32.totalorder %s2117_s26, %s2112_s4 }
  0x34   : > { %p2115_p10 = pnand %p2114_p9, %p2113_p8 }
  0x35   : > { %p2120_p2 = por %p2119_p0, %p2118_p11 }
  0x36   : > { %p2116_p13 = pneg %p2115_p10 }
  0x38   : > { %p2121_p5 = pnand %p2120_p2, %p2116_p13 }
  0x3a   : > { %2124 = shalt.err (!%p2121_p5)
}
  0x3b   : > { %1868 = dma.hbm_to_vmem [thread:$0]  (!%p2391_p7), %s363_s21, 128, %s365_s14, %s353_s24  }
  0x3c   : > { %373 = sbr.rel (%p2309_p3) target bundleno = 648 (0x288), region = 56  ;;  %s2408_s15 = sand.u32 (!%p2309_p3), 1, %s2210_s10  }
  0x3d   : > { %s1364_s29 = sshll.u32 (!%p2309_p3), %s2408_s15, 3  ;;  %s376_s13 = scalar_lea.sflag (!%p2309_p3), [#allocation3], %s2408_s15 }
  0x3e   : > { %s2414_s2 = scalar_lea.vmem (!%p2309_p3), [#allocation2], %s1364_s29 }
  0x41   : > { %2185 = dma.done.wait (%p2370_p12), %s376_s13, 128  }
  0x42   : > { %2187 = vsyncadd (%p2370_p12), %s376_s13, 4294967168 }
  0x43   : > { %2189 = dma.done.wait (%p49_p1), [#allocation6], 1056  }
  0x44   : > { %2191 = vsyncadd (%p49_p1), [#allocation6], 4294966240 }
  0x45   : > { %2193 = dma.done.wait (%p49_p1), [#allocation9], 4128  }
  0x46   : > { %2195 = vsyncadd (%p49_p1), [#allocation9], 4294963168 }
  0x47   : > { %2197 = dma.done.wait (%p49_p1), [#allocation12], 6144  }
  0x48   : > { %2199 = vsyncadd (%p49_p1), [#allocation12], 4294961152  ;;  %v1398_v0 = vld [vmem:[#allocation5 + $0x30] sm:$0xf]  ;;  %v1737_v1 = vld [vmem:[#allocation5 + $0x34] sm:$0xf0] }
  0x49   : > { %v1736_v2 = vld [vmem:[#allocation5 + $0x34] sm:$0xf]  ;;  %v1399_v3 = vor.u32 %v1737_v1, %v1398_v0  ;;  %v1400_v4 = vld [vmem:[#allocation5 + $0x38] sm:$0xf0]  ;;  %v1390_v5 = vld [vmem:[#allocation5 + $0x20] sm:$0xf] }
  0x4a   : > { %v1735_v6 = vld [vmem:[#allocation5 + $0x24] sm:$0xf0]  ;;  %v1403_v7 = vor.u32 %v1736_v2, %v1400_v4  ;;  %v1734_v8 = vld [vmem:[#allocation5 + $0x24] sm:$0xf]  ;;  %v1392_v9 = vld [vmem:[#allocation5 + $0x28] sm:$0xf0] }
  0x4b   : > { %510 = vmatpush.bf16.msra.mxu0 %v1399_v3  ;;  %v1391_v10 = vor.u32 %v1735_v6, %v1390_v5  ;;  %v1395_v11 = vor.u32 %v1734_v8, %v1392_v9  ;;  %v1382_v12 = vld [vmem:[#allocation5 + $0x10] sm:$0xf]  ;;  %v1733_v13 = vld [vmem:[#allocation5 + $0x14] sm:$0xf0]  ;;  %v1732_v14 = vld [vmem:[#allocation5 + $0x14] sm:$0xf] }
  0x4c   : > { %523 = vmatpush.bf16.msra.mxu1 %v1403_v7  ;;  %v1384_v15 = vld [vmem:[#allocation5 + $0x18] sm:$0xf0]  ;;  %v1464_v16 = vld [vmem:[#allocation8 + $0x70] sm:$0xf]  ;;  %v1374_v17 = vld [vmem:[#allocation5] sm:$0xf]  ;;  %v1383_v21 = vor.u32 %v1733_v13, %v1382_v12 }
  0x4d   : > { %v1753_v18 = vld [vmem:[#allocation8 + $0x74] sm:$0xf0]  ;;  %v1528_v19 = vld [vmem:[#allocation8 + $0xf0] sm:$0xf]  ;;  %v1731_v22 = vld [vmem:[#allocation5 + $0x4] sm:$0xf0]  ;;  %v1387_v27 = vor.u32 %v1732_v14, %v1384_v15 }
  0x4e   : > { %v1769_v20 = vld [vmem:[#allocation8 + $0xf4] sm:$0xf0]  ;;  %v1730_v23 = vld [vmem:[#allocation5 + $0x4] sm:$0xf]  ;;  %v1376_v24 = vld [vmem:[#allocation5 + $0x8] sm:$0xf0]  ;;  %v1465_v25 = vor.u32 %v1753_v18, %v1464_v16  ;;  %v1375_v39 = vor.u32 %v1731_v22, %v1374_v17 }
  0x4f   : > { %511 = vmatpush.bf16.msra.mxu0 %v1391_v10  ;;  %v1529_v26 = vor.u32 %v1769_v20, %v1528_v19  ;;  %v1752_v28 = vld [vmem:[#allocation8 + $0x74] sm:$0xf]  ;;  %v1456_v29 = vld [vmem:[#allocation8 + $0x60] sm:$0xf]  ;;  %v1751_v30 = vld [vmem:[#allocation8 + $0x64] sm:$0xf0]  ;;  %v1379_v43 = vor.u32 %v1730_v23, %v1376_v24 }
  0x50   : > { %524 = vmatpush.bf16.msra.mxu1 %v1395_v11  ;;  %736 = vmatpush.bf16.msra.mxu2 %v1465_v25  ;;  %v1466_v31 = vld [vmem:[#allocation8 + $0x78] sm:$0xf0]  ;;  %v1457_v32 = vor.u32 %v1751_v30, %v1456_v29  ;;  %v1520_v33 = vld [vmem:[#allocation8 + $0xe0] sm:$0xf]  ;;  %v1767_v34 = vld [vmem:[#allocation8 + $0xe4] sm:$0xf0] }
  0x51   : > { %749 = vmatpush.bf16.msra.mxu3 %v1529_v26  ;;  %v446_v35 = vld [vmem:[%s2414_s2] sm:$0xff]  ;;  %v1521_v38 = vor.u32 %v1767_v34, %v1520_v33  ;;  %v1469_v44 = vor.u32 %v1752_v28, %v1466_v31  ;;  %v1750_v47 = vld [vmem:[#allocation8 + $0x64] sm:$0xf]  ;;  %v1440_v54 = vld [vmem:[#allocation8 + $0x40] sm:$0xf]  ;;  %vm502_vm0 = vcmask 523264  }
  0x52   : > { %v1768_v36 = vld [vmem:[#allocation8 + $0xf4] sm:$0xf]  ;;  %v1530_v37 = vld [vmem:[#allocation8 + $0xf8] sm:$0xf0]  ;;  %v1448_v40 = vld [vmem:[#allocation8 + $0x50] sm:$0xf]  ;;  %v447_v51 = vpack.c.bf16 %v446_v35, %v446_v35 }
  0x53   : > { %512 = vmatpush.bf16.msra.mxu0 %v1383_v21  ;;  %v1749_v41 = vld [vmem:[#allocation8 + $0x54] sm:$0xf0]  ;;  %v1512_v42 = vld [vmem:[#allocation8 + $0xd0] sm:$0xf]  ;;  %v1533_v46 = vor.u32 %v1768_v36, %v1530_v37  ;;  %v1458_v48 = vld [vmem:[#allocation8 + $0x68] sm:$0xf0] }
  0x54   : > { %525 = vmatpush.bf16.msra.mxu1 %v1387_v27  ;;  %v1765_v45 = vld [vmem:[#allocation8 + $0xd4] sm:$0xf0]  ;;  %737 = vmatpush.bf16.msra.mxu2 %v1457_v32  ;;  %v1766_v49 = vld [vmem:[#allocation8 + $0xe4] sm:$0xf]  ;;  %v1449_v50 = vor.u32 %v1749_v41, %v1448_v40  ;;  %v1522_v52 = vld [vmem:[#allocation8 + $0xe8] sm:$0xf0]  ;;  %v1461_v58 = vor.u32 %v1750_v47, %v1458_v48 }
  0x55   : > { %750 = vmatpush.bf16.msra.mxu3 %v1521_v38  ;;  %v1513_v53 = vor.u32 %v1765_v45, %v1512_v42  ;;  %v1747_v55 = vld [vmem:[#allocation8 + $0x44] sm:$0xf0]  ;;  %v1504_v56 = vld [vmem:[#allocation8 + $0xc0] sm:$0xf]  ;;  %v1525_v59 = vor.u32 %v1766_v49, %v1522_v52  ;;  %v1748_v60 = vld [vmem:[#allocation8 + $0x54] sm:$0xf] }
  0x56   : > { %v1763_v57 = vld [vmem:[#allocation8 + $0xc4] sm:$0xf0]  ;;  %v1450_v61 = vld [vmem:[#allocation8 + $0x58] sm:$0xf0]  ;;  %v1764_v62 = vld [vmem:[#allocation8 + $0xd4] sm:$0xf]  ;;  %v1441_v63 = vor.u32 %v1747_v55, %v1440_v54 }
  0x57   : > { %513 = vmatpush.bf16.msra.mxu0 %v1375_v39  ;;  %v1514_v0 = vld [vmem:[#allocation8 + $0xd8] sm:$0xf0]  ;;  %v1505_v1 = vor.u32 %v1763_v57, %v1504_v56  ;;  %v1432_v2 = vld [vmem:[#allocation8 + $0x30] sm:$0xf]  ;;  %v1745_v3 = vld [vmem:[#allocation8 + $0x34] sm:$0xf0]  ;;  %v1453_v6 = vor.u32 %v1748_v60, %v1450_v61 }
  0x58   : > { %526 = vmatpush.bf16.msra.mxu1 %v1379_v43  ;;  %738 = vmatpush.bf16.msra.mxu2 %v1449_v50  ;;  %v1496_v4 = vld [vmem:[#allocation8 + $0xb0] sm:$0xf]  ;;  %v1761_v5 = vld [vmem:[#allocation8 + $0xb4] sm:$0xf0]  ;;  %v1746_v7 = vld [vmem:[#allocation8 + $0x44] sm:$0xf]  ;;  %v1517_v8 = vor.u32 %v1764_v62, %v1514_v0  ;;  %v1433_v12 = vor.u32 %v1745_v3, %v1432_v2 }
  0x59   : > { %751 = vmatpush.bf16.msra.mxu3 %v1513_v53  ;;  %v1442_v9 = vld [vmem:[#allocation8 + $0x48] sm:$0xf0]  ;;  %v1762_v10 = vld [vmem:[#allocation8 + $0xc4] sm:$0xf]  ;;  %v1497_v13 = vor.u32 %v1761_v5, %v1496_v4  ;;  %v1424_v14 = vld [vmem:[#allocation8 + $0x20] sm:$0xf] }
  0x5a   : > { %1404 = vmatmul.msk.bf16.vlgmr.msra.gmra.mxu0 %vm502_vm0, %v447_v51  ;;  %v1506_v11 = vld [vmem:[#allocation8 + $0xc8] sm:$0xf0]  ;;  %v1743_v15 = vld [vmem:[#allocation8 + $0x24] sm:$0xf0]  ;;  %v1488_v16 = vld [vmem:[#allocation8 + $0xa0] sm:$0xf]  ;;  %v1445_v18 = vor.u32 %v1746_v7, %v1442_v9 }
  0x5b   : > { %762 = vmatpush.bf16.msrb.mxu0 %v1469_v44  ;;  %1405 = vmatmul.msk.bf16.vlgmr.msra.gmra.mxu1 %vm502_vm0, %v447_v51  ;;  %v1759_v17 = vld [vmem:[#allocation8 + $0xa4] sm:$0xf0]  ;;  %v1509_v19 = vor.u32 %v1762_v10, %v1506_v11  ;;  %v1744_v20 = vld [vmem:[#allocation8 + $0x34] sm:$0xf]  ;;  %v1434_v21 = vld [vmem:[#allocation8 + $0x38] sm:$0xf0]  ;;  %v1425_v22 = vor.u32 %v1743_v15, %v1424_v14 }
  0x5c   : > { %775 = vmatpush.bf16.msrb.mxu1 %v1533_v46  ;;  %739 = vmatpush.bf16.msra.mxu2 %v1441_v63  ;;  %v1760_v23 = vld [vmem:[#allocation8 + $0xb4] sm:$0xf]  ;;  %v1498_v24 = vld [vmem:[#allocation8 + $0xb8] sm:$0xf0]  ;;  %v1489_v25 = vor.u32 %v1759_v17, %v1488_v16  ;;  %v1437_v26 = vor.u32 %v1744_v20, %v1434_v21  ;;  %v1742_v28 = vld [vmem:[#allocation8 + $0x24] sm:$0xf] }
  0x5d   : > { %752 = vmatpush.bf16.msra.mxu3 %v1505_v1  ;;  %v1501_v27 = vor.u32 %v1760_v23, %v1498_v24  ;;  %v1426_v29 = vld [vmem:[#allocation8 + $0x28] sm:$0xf0]  ;;  %v1758_v30 = vld [vmem:[#allocation8 + $0xa4] sm:$0xf]  ;;  %v1416_v34 = vld [vmem:[#allocation8 + $0x10] sm:$0xf] }
  0x5e   : > { %v1490_v31 = vld [vmem:[#allocation8 + $0xa8] sm:$0xf0]  ;;  %v1429_v32 = vor.u32 %v1742_v28, %v1426_v29  ;;  %v1741_v35 = vld [vmem:[#allocation8 + $0x14] sm:$0xf0]  ;;  %v1480_v37 = vld [vmem:[#allocation8 + $0x90] sm:$0xf] }
  0x5f   : > { %763 = vmatpush.bf16.msrb.mxu0 %v1461_v58  ;;  %v1493_v33 = vor.u32 %v1758_v30, %v1490_v31  ;;  %v1417_v36 = vor.u32 %v1741_v35, %v1416_v34  ;;  %v1757_v38 = vld [vmem:[#allocation8 + $0x94] sm:$0xf0]  ;;  %v1740_v39 = vld [vmem:[#allocation8 + $0x14] sm:$0xf]  ;;  %v1418_v41 = vld [vmem:[#allocation8 + $0x18] sm:$0xf0] }
  0x60   : > { %776 = vmatpush.bf16.msrb.mxu1 %v1525_v59  ;;  %740 = vmatpush.bf16.msra.mxu2 %v1433_v12  ;;  %v1481_v40 = vor.u32 %v1757_v38, %v1480_v37  ;;  %v1756_v42 = vld [vmem:[#allocation8 + $0x94] sm:$0xf]  ;;  %v1482_v43 = vld [vmem:[#allocation8 + $0x98] sm:$0xf0]  ;;  %v1421_v44 = vor.u32 %v1740_v39, %v1418_v41  ;;  %v1408_v46 = vld [vmem:[#allocation8] sm:$0xf] }
  0x61   : > { %753 = vmatpush.bf16.msra.mxu3 %v1497_v13  ;;  %v1485_v45 = vor.u32 %v1756_v42, %v1482_v43  ;;  %v1739_v47 = vld [vmem:[#allocation8 + $0x4] sm:$0xf0]  ;;  %v1472_v48 = vld [vmem:[#allocation8 + $0x80] sm:$0xf]  ;;  %v1738_v51 = vld [vmem:[#allocation8 + $0x4] sm:$0xf] }
  0x62   : > { %v1409_v49 = vor.u32 %v1739_v47, %v1408_v46  ;;  %v1755_v50 = vld [vmem:[#allocation8 + $0x84] sm:$0xf0]  ;;  %v1410_v52 = vld [vmem:[#allocation8 + $0x8] sm:$0xf0]  ;;  %v1754_v55 = vld [vmem:[#allocation8 + $0x84] sm:$0xf] }
  0x63   : > { %764 = vmatpush.bf16.msrb.mxu0 %v1453_v6  ;;  %v1473_v53 = vor.u32 %v1755_v50, %v1472_v48  ;;  %v1413_v54 = vor.u32 %v1738_v51, %v1410_v52  ;;  %v1474_v56 = vld [vmem:[#allocation8 + $0x88] sm:$0xf0]  ;;  %v1656_v58 = vld [vmem:[#allocation11 + $0xf0] sm:$0xf]  ;;  %v1801_v59 = vld [vmem:[#allocation11 + $0xf4] sm:$0xf0] }
  0x64   : > { %777 = vmatpush.bf16.msrb.mxu1 %v1517_v8  ;;  %741 = vmatpush.bf16.msra.mxu2 %v1425_v22  ;;  %v1477_v57 = vor.u32 %v1754_v55, %v1474_v56  ;;  %v1800_v60 = vld [vmem:[#allocation11 + $0xf4] sm:$0xf]  ;;  %v1657_v61 = vor.u32 %v1801_v59, %v1656_v58  ;;  %v1658_v62 = vld [vmem:[#allocation11 + $0xf8] sm:$0xf0]  ;;  %v1648_v63 = vld [vmem:[#allocation11 + $0xe0] sm:$0xf] }
  0x65   : > { %754 = vmatpush.bf16.msra.mxu3 %v1489_v25  ;;  %v1799_v0 = vld [vmem:[#allocation11 + $0xe4] sm:$0xf0]  ;;  %v1661_v1 = vor.u32 %v1800_v60, %v1658_v62  ;;  %v1798_v2 = vld [vmem:[#allocation11 + $0xe4] sm:$0xf]  ;;  %v1650_v3 = vld [vmem:[#allocation11 + $0xe8] sm:$0xf0] }
  0x66   : > { %v1592_v4 = vld [vmem:[#allocation11 + $0x70] sm:$0xf]  ;;  %v1649_v5 = vor.u32 %v1799_v0, %v1648_v63  ;;  %v1785_v6 = vld [vmem:[#allocation11 + $0x74] sm:$0xf0]  ;;  %v1784_v7 = vld [vmem:[#allocation11 + $0x74] sm:$0xf]  ;;  %v1653_v9 = vor.u32 %v1798_v2, %v1650_v3 }
  0x67   : > { %765 = vmatpush.bf16.msrb.mxu0 %v1445_v18  ;;  %v1594_v8 = vld [vmem:[#allocation11 + $0x78] sm:$0xf0]  ;;  %v1593_v10 = vor.u32 %v1785_v6, %v1592_v4  ;;  %v1640_v12 = vld [vmem:[#allocation11 + $0xd0] sm:$0xf]  ;;  %v1797_v13 = vld [vmem:[#allocation11 + $0xd4] sm:$0xf0] }
  0x68   : > { %778 = vmatpush.bf16.msrb.mxu1 %v1509_v19  ;;  %742 = vmatpush.bf16.msra.mxu2 %v1417_v36  ;;  %v1597_v11 = vor.u32 %v1784_v7, %v1594_v8  ;;  %v1796_v14 = vld [vmem:[#allocation11 + $0xd4] sm:$0xf]  ;;  %v1642_v15 = vld [vmem:[#allocation11 + $0xd8] sm:$0xf0]  ;;  %v1584_v16 = vld [vmem:[#allocation11 + $0x60] sm:$0xf]  ;;  %v1641_v21 = vor.u32 %v1797_v13, %v1640_v12 }
  0x69   : > { %755 = vmatpush.bf16.msra.mxu3 %v1481_v40  ;;  %v1783_v17 = vld [vmem:[#allocation11 + $0x64] sm:$0xf0]  ;;  %v1782_v19 = vld [vmem:[#allocation11 + $0x64] sm:$0xf]  ;;  %v1586_v20 = vld [vmem:[#allocation11 + $0x68] sm:$0xf0]  ;;  %v1645_v25 = vor.u32 %v1796_v14, %v1642_v15 }
  0x6a   : > { %v1585_v18 = vor.u32 %v1783_v17, %v1584_v16  ;;  %v1589_v22 = vor.u32 %v1782_v19, %v1586_v20  ;;  %v1632_v23 = vld [vmem:[#allocation11 + $0xc0] sm:$0xf]  ;;  %v1795_v24 = vld [vmem:[#allocation11 + $0xc4] sm:$0xf0]  ;;  %v1780_v28 = vld [vmem:[#allocation11 + $0x54] sm:$0xf] }
  0x6b   : > { %766 = vmatpush.bf16.msrb.mxu0 %v1437_v26  ;;  %v1576_v26 = vld [vmem:[#allocation11 + $0x50] sm:$0xf]  ;;  %v1794_v29 = vld [vmem:[#allocation11 + $0xc4] sm:$0xf]  ;;  %v1634_v30 = vld [vmem:[#allocation11 + $0xc8] sm:$0xf0]  ;;  %v1633_v35 = vor.u32 %v1795_v24, %v1632_v23 }
  0x6c   : > { %779 = vmatpush.bf16.msrb.mxu1 %v1501_v27  ;;  %743 = vmatpush.bf16.msra.mxu2 %v1409_v49  ;;  %v1781_v27 = vld [vmem:[#allocation11 + $0x54] sm:$0xf0]  ;;  %v1578_v31 = vld [vmem:[#allocation11 + $0x58] sm:$0xf0]  ;;  %v1568_v34 = vld [vmem:[#allocation11 + $0x40] sm:$0xf]  ;;  %v1637_v39 = vor.u32 %v1794_v29, %v1634_v30 }
  0x6d   : > { %756 = vmatpush.bf16.msra.mxu3 %v1473_v53  ;;  %v1779_v36 = vld [vmem:[#allocation11 + $0x44] sm:$0xf0]  ;;  %v1778_v37 = vld [vmem:[#allocation11 + $0x44] sm:$0xf]  ;;  %v1570_v38 = vld [vmem:[#allocation11 + $0x48] sm:$0xf0] }
  0x6e   : > { %v1624_v40 = vld [vmem:[#allocation11 + $0xb0] sm:$0xf]  ;;  %v1793_v41 = vld [vmem:[#allocation11 + $0xb4] sm:$0xf0]  ;;  %v1792_v42 = vld [vmem:[#allocation11 + $0xb4] sm:$0xf] }
  0x6f   : > { %767 = vmatpush.bf16.msrb.mxu0 %v1429_v32  ;;  %v1577_v32 = vor.u32 %v1781_v27, %v1576_v26  ;;  %v1626_v43 = vld [vmem:[#allocation11 + $0xb8] sm:$0xf0]  ;;  %v1625_v46 = vor.u32 %v1793_v41, %v1624_v40  ;;  %v1616_v63 = vld [vmem:[#allocation11 + $0xa0] sm:$0xf]  ;;  %v1791_v0 = vld [vmem:[#allocation11 + $0xa4] sm:$0xf0] }
  0x70   : > { %780 = vmatpush.bf16.msrb.mxu1 %v1493_v33  ;;  %992 = vmatpush.bf16.msrb.mxu2 %v1593_v10  ;;  %v1581_v33 = vor.u32 %v1780_v28, %v1578_v31  ;;  %v456_v47 = vld [vmem:[#allocation7] sm:$0x3]  ;;  %v1629_v48 = vor.u32 %v1792_v42, %v1626_v43  ;;  %v1617_v2 = vor.u32 %v1791_v0, %v1616_v63  ;;  %v1618_v3 = vld [vmem:[#allocation11 + $0xa8] sm:$0xf0]  ;;  %v1777_v6 = vld [vmem:[#allocation11 + $0x34] sm:$0xf0] }
  0x71   : > { %1005 = vmatpush.bf16.msrb.mxu3 %v1657_v61  ;;  %v458_v49 = vperm.slane %v456_v47, 0  ;;  %v459_v50 = vperm.slane %v456_v47, 1  ;;  %v1776_v7 = vld [vmem:[#allocation11 + $0x34] sm:$0xf]  ;;  %v1789_v12 = vld [vmem:[#allocation11 + $0x94] sm:$0xf0] }
  0x72   : > { %v1788_v13 = vld [vmem:[#allocation11 + $0x94] sm:$0xf]  ;;  %v1610_v15 = vld [vmem:[#allocation11 + $0x98] sm:$0xf0]  ;;  %v1552_v17 = vld [vmem:[#allocation11 + $0x20] sm:$0xf] }
  0x73   : > { %768 = vmatpush.bf16.msrb.mxu0 %v1421_v44  ;;  %v1569_v44 = vor.u32 %v1779_v36, %v1568_v34  ;;  %v1613_v16 = vor.u32 %v1788_v13, %v1610_v15  ;;  %v1774_v19 = vld [vmem:[#allocation11 + $0x24] sm:$0xf]  ;;  %v1600_v23 = vld [vmem:[#allocation11 + $0x80] sm:$0xf]  ;;  %v1787_v24 = vld [vmem:[#allocation11 + $0x84] sm:$0xf0] }
  0x74   : > { %781 = vmatpush.bf16.msrb.mxu1 %v1485_v45  ;;  %993 = vmatpush.bf16.msrb.mxu2 %v1585_v18  ;;  %v1573_v45 = vor.u32 %v1778_v37, %v1570_v38  ;;  %v1775_v18 = vld [vmem:[#allocation11 + $0x24] sm:$0xf0]  ;;  %v1786_v26 = vld [vmem:[#allocation11 + $0x84] sm:$0xf]  ;;  %v1602_v27 = vld [vmem:[#allocation11 + $0x88] sm:$0xf0] }
  0x75   : > { %1006 = vmatpush.bf16.msrb.mxu3 %v1649_v5  ;;  %v1560_v5 = vld [vmem:[#allocation11 + $0x30] sm:$0xf]  ;;  %v1553_v20 = vor.u32 %v1775_v18, %v1552_v17  ;;  %v1605_v28 = vor.u32 %v1786_v26, %v1602_v27  ;;  %v1773_v30 = vld [vmem:[#allocation11 + $0x14] sm:$0xf0]  ;;  %v1772_v31 = vld [vmem:[#allocation11 + $0x14] sm:$0xf] }
  0x76   : > { %v1561_v8 = vor.u32 %v1777_v6, %v1560_v5  ;;  %v1544_v29 = vld [vmem:[#allocation11 + $0x10] sm:$0xf]  ;;  %v1771_v36 = vld [vmem:[#allocation11 + $0x4] sm:$0xf0]  ;;  %v1770_v37 = vld [vmem:[#allocation11 + $0x4] sm:$0xf] }
  0x77   : > { %769 = vmatpush.bf16.msrb.mxu0 %v1413_v54  ;;  %v1817_v41 = vld [vmem:[#allocation13 + $0x78] sm:$0xff]  ;;  %v1816_v43 = vld [vmem:[#allocation13 + $0x70] sm:$0xff]  ;;  %v1814_v47 = vld [vmem:[#allocation13 + $0x60] sm:$0xff]  ;;  %s1727_s23 = sshll.u32 %s2304_s16, 3  ;;  %s444_s1 = scalar_lea.vmem [#allocation14], %s1364_s29 }
  0x78   : > { %782 = vmatpush.bf16.msrb.mxu1 %v1477_v57  ;;  %994 = vmatpush.bf16.msrb.mxu2 %v1577_v32  ;;  %v1545_v32 = vor.u32 %v1773_v30, %v1544_v29  ;;  %v1809_v42 = vld [vmem:[#allocation13 + $0x38] sm:$0xff]  ;;  %v1806_v6 = vld [vmem:[#allocation13 + $0x20] sm:$0xff]  ;;  %v826_v15 = vld [vmem:[%s2482_s6] sm:$0x3]  ;;  %s1220_s28 = scalar_lea.hbm %s2485_s9, %s1727_s23  ;;  %s1222_s26 = sshll.u32 %s444_s1, 4  ;;  %s1223_s26 = int_to_ptr.vmem [resolvable:$true] %s1222_s26 }
  0x79   : > { %1007 = vmatpush.bf16.msrb.mxu3 %v1641_v21  ;;  %v1554_v21 = vld [vmem:[#allocation11 + $0x28] sm:$0xf0]  ;;  %v1813_v5 = vld [vmem:[#allocation13 + $0x58] sm:$0xff]  ;;  %v1802_v13 = vld [vmem:[#allocation13] sm:$0xff]  ;;  %s1224_s3 = sshll.u32 %s1220_s28, 4  ;;  %s1210_s16 = scalar_lea.sflag [#allocation4], %s2408_s15  ;;  %s1225_s3 = int_to_ptr.hbm [resolvable:$true] %s1224_s3 }
  0x7a   : > { %s2154_s27 = sshra.s32 %s1225_s3, 4  ;;  %s2160_s29 = scalar_lea.hbm %s2485_s9, 16  ;;  %s2155_s27 = int_to_ptr.hbm [resolvable:$true] %s2154_s27 }
  0x7b   : > { %1018 = vmatpush.bf16.msra.mxu0 %v1597_v11  ;;  %v1608_v11 = vld [vmem:[#allocation11 + $0x90] sm:$0xf]  ;;  %s2156_s13 = scalar_lea.hbm %s2155_s27, 8  ;;  %p2161_p12 = scmp.lt.s32.totalorder %s2155_s27, %s2485_s9 }
  0x7c   : > { %1031 = vmatpush.bf16.msra.mxu1 %v1661_v1  ;;  %995 = vmatpush.bf16.msrb.mxu2 %v1569_v44  ;;  %v1790_v1 = vld [vmem:[#allocation11 + $0xa4] sm:$0xf]  ;;  %v1609_v14 = vor.u32 %v1789_v12, %v1608_v11  ;;  %v1808_v44 = vld [vmem:[#allocation13 + $0x30] sm:$0xff]  ;;  %v1803_v12 = vld [vmem:[#allocation13 + $0x8] sm:$0xff]  ;;  %p2157_p1 = scmp.ne.s32.totalorder %s2155_s27, %s2156_s13  ;;  %p2162_p7 = scmp.lt.s32.totalorder %s2160_s29, %s2156_s13 }
  0x7d   : > { %1008 = vmatpush.bf16.msrb.mxu3 %v1633_v35  ;;  %v1621_v4 = vor.u32 %v1790_v1, %v1618_v3  ;;  %v1536_v35 = vld [vmem:[#allocation11] sm:$0xf] }
  0x7e   : > { %v1537_v38 = vor.u32 %v1771_v36, %v1536_v35  ;;  %v1810_v11 = vld [vmem:[#allocation13 + $0x40] sm:$0xff]  ;;  %v1929_v36 = vld [vmem:[%s2484_s8] ss:$0 sm:$0xff]  ;;  %p2158_p3 = pnand %p2157_p1, %p2377_p4  ;;  %p2163_p8 = por %p2162_p7, %p2161_p12 }
  0x7f   : > { %1019 = vmatpush.bf16.msra.mxu0 %v1589_v22  ;;  %v1557_v22 = vor.u32 %v1774_v19, %v1554_v21 }
  0x80   : > { %1032 = vmatpush.bf16.msra.mxu1 %v1653_v9  ;;  %v1562_v9 = vld [vmem:[#allocation11 + $0x38] sm:$0xf0]  ;;  %996 = vmatpush.bf16.msrb.mxu2 %v1561_v8  ;;  %p2159_p5 = pneg %p2158_p3 }
  0x81   : > { %1009 = vmatpush.bf16.msrb.mxu3 %v1625_v46  ;;  %v1565_v10 = vor.u32 %v1776_v7, %v1562_v9  ;;  %v570_v46 = vld [vmem:[#allocation10] sm:$0x3]  ;;  %v1812_v7 = vld [vmem:[#allocation13 + $0x50] sm:$0xff]  ;;  %v1811_v9 = vld [vmem:[#allocation13 + $0x48] sm:$0xff] }
  0x82   : > { %v1805_v8 = vld [vmem:[#allocation13 + $0x18] sm:$0xff]  ;;  %p2164_p9 = pnand %p2163_p8, %p2159_p5 }
  0x83   : > { %1020 = vmatpush.bf16.msra.mxu0 %v1581_v33  ;;  %v1546_v33 = vld [vmem:[#allocation11 + $0x18] sm:$0xf0] }
  0x84   : > { %1033 = vmatpush.bf16.msra.mxu1 %v1645_v25  ;;  %997 = vmatpush.bf16.msrb.mxu2 %v1553_v20  ;;  %v1601_v25 = vor.u32 %v1787_v24, %v1600_v23  ;;  %v1549_v34 = vor.u32 %v1772_v31, %v1546_v33 }
  0x85   : > { %1010 = vmatpush.bf16.msrb.mxu3 %v1617_v2 }
  0x87   : > { %1021 = vmatpush.bf16.msra.mxu0 %v1573_v45  ;;  %v1815_v45 = vld [vmem:[#allocation13 + $0x68] sm:$0xff] }
  0x88   : > { %1034 = vmatpush.bf16.msra.mxu1 %v1637_v39  ;;  %998 = vmatpush.bf16.msrb.mxu2 %v1545_v32  ;;  %v1538_v39 = vld [vmem:[#allocation11 + $0x8] sm:$0xf0] }
  0x89   : > { %1011 = vmatpush.bf16.msrb.mxu3 %v1609_v14  ;;  %v1541_v40 = vor.u32 %v1770_v37, %v1538_v39 }
  0x8b   : > { %1022 = vmatpush.bf16.msra.mxu0 %v1565_v10  ;;  %v1804_v10 = vld [vmem:[#allocation13 + $0x10] sm:$0xff] }
  0x8c   : > { %1035 = vmatpush.bf16.msra.mxu1 %v1629_v48  ;;  %999 = vmatpush.bf16.msrb.mxu2 %v1537_v38  ;;  %v573_v48 = vperm.slane %v570_v46, 1 }
  0x8d   : > { %1012 = vmatpush.bf16.msrb.mxu3 %v1601_v25 }
  0x8f   : > { %1023 = vmatpush.bf16.msra.mxu0 %v1557_v22  ;;  %v828_v22 = vperm.slane %v826_v15, 0 }
  0x90   : > { %1036 = vmatpush.bf16.msra.mxu1 %v1621_v4  ;;  %v1807_v4 = vld [vmem:[#allocation13 + $0x28] sm:$0xff] }
  0x93   : > { %1024 = vmatpush.bf16.msra.mxu0 %v1549_v34 }
  0x94   : > { %1037 = vmatpush.bf16.msra.mxu1 %v1613_v16  ;;  %v829_v16 = vperm.slane %v826_v15, 1 }
  0x97   : > { %1025 = vmatpush.bf16.msra.mxu0 %v1541_v40 }
  0x98   : > { %1038 = vmatpush.bf16.msra.mxu1 %v1605_v28 }
  0xd7   : > { %v515_v51 = vpop.f32.mrf.mxu0 }
  0xd8   : > { %v516_v52 = vadd.f32 %v515_v51, %v458_v49  ;;  %v528_v53 = vpop.f32.mrf.mxu1 }
  0xd9   : > { %v529_v54 = vadd.f32 %v528_v53, %v459_v50  ;;  %v572_v53 = vperm.slane %v570_v46, 0 }
  0xda   : > { %v532_v55 = vmul.f32 0.01, %v516_v52 }
  0xdb   : > { %v533_v56 = vmul.f32 0.01, %v529_v54 }
  0xdc   : > { %v534_v57 = vmax.f32 %v516_v52, %v532_v55 }
  0xdd   : > { %v535_v58 = vmax.f32 %v529_v54, %v533_v56 }
  0xde   : > { %v536_v59 = vpack.c.bf16 %v534_v57, %v534_v57 }
  0xdf   : > { %v517_v60 = vpop.f32.mrf.mxu0  ;;  %v537_v61 = vpack.c.bf16 %v535_v58, %v535_v58 }
  0xe0   : > { %v530_v62 = vpop.f32.mrf.mxu1  ;;  %744 = vmatmul.bf16.vlgmr.msra.gmra.mxu2 %v536_v59  ;;  %770 = vmatmul.bf16.vlgmr.msrb.gmra.mxu0 %v536_v59 }
  0xe1   : > { %757 = vmatmul.bf16.vlgmr.msra.gmra.mxu3 %v537_v61  ;;  %783 = vmatmul.bf16.vlgmr.msrb.gmra.mxu1 %v537_v61 }
  0xe2   : > { %1195 = vmatpush.bf16.msra.mxu3 %v1817_v41  ;;  %1182 = vmatpush.bf16.msra.mxu2 %v1809_v42 }
  0xe6   : > { %1196 = vmatpush.bf16.msra.mxu3 %v1816_v43  ;;  %1183 = vmatpush.bf16.msra.mxu2 %v1808_v44 }
  0xea   : > { %1197 = vmatpush.bf16.msra.mxu3 %v1815_v45  ;;  %1184 = vmatpush.bf16.msra.mxu2 %v1807_v4 }
  0xee   : > { %1198 = vmatpush.bf16.msra.mxu3 %v1814_v47  ;;  %1185 = vmatpush.bf16.msra.mxu2 %v1806_v6 }
  0xf2   : > { %1199 = vmatpush.bf16.msra.mxu3 %v1813_v5  ;;  %1186 = vmatpush.bf16.msra.mxu2 %v1805_v8 }
  0xf6   : > { %1200 = vmatpush.bf16.msra.mxu3 %v1812_v7  ;;  %1187 = vmatpush.bf16.msra.mxu2 %v1804_v10 }
  0xfa   : > { %1201 = vmatpush.bf16.msra.mxu3 %v1811_v9  ;;  %1188 = vmatpush.bf16.msra.mxu2 %v1803_v12 }
  0xfe   : > { %1202 = vmatpush.bf16.msra.mxu3 %v1810_v11  ;;  %1189 = vmatpush.bf16.msra.mxu2 %v1802_v13 }
 0x15d   : > { %v771_v49 = vpop.f32.mrf.mxu0 }
 0x15e   : > { %v772_v50 = vadd.f32 %v771_v49, %v573_v48  ;;  %v784_v51 = vpop.f32.mrf.mxu1 }
 0x160   : > { %v785_v52 = vadd.f32 %v784_v51, %v772_v50 }
 0x162   : > { %v789_v54 = vmul.f32 0.01, %v785_v52 }
 0x163   : > { %v745_v55 = vpop.f32.mrf.mxu2 }
 0x164   : > { %v791_v56 = vmax.f32 %v785_v52, %v789_v54  ;;  %v746_v57 = vadd.f32 %v745_v55, %v572_v53  ;;  %v758_v58 = vpop.f32.mrf.mxu3 }
 0x165   : > { %v773_v59 = vpop.f32.mrf.mxu0 }
 0x166   : > { %v793_v60 = vpack.c.bf16 %v791_v56, %v791_v56  ;;  %v759_v61 = vadd.f32 %v758_v58, %v746_v57  ;;  %v786_v62 = vpop.f32.mrf.mxu1 }
 0x168   : > { %v788_v63 = vmul.f32 0.01, %v759_v61  ;;  %1013 = vmatmul.bf16.vlgmr.msrb.gmra.mxu3 %v793_v60  ;;  %1039 = vmatmul.bf16.vlgmr.msra.gmra.mxu1 %v793_v60 }
 0x16a   : > { %v790_v0 = vmax.f32 %v759_v61, %v788_v63 }
 0x16b   : > { %v747_v1 = vpop.f32.mrf.mxu2 }
 0x16c   : > { %v792_v2 = vpack.c.bf16 %v790_v0, %v790_v0  ;;  %v760_v3 = vpop.f32.mrf.mxu3 }
 0x16e   : > { %1000 = vmatmul.bf16.vlgmr.msrb.gmra.mxu2 %v792_v2  ;;  %1026 = vmatmul.bf16.vlgmr.msra.gmra.mxu0 %v792_v2 }
 0x1e5   : > { %v1040_v14 = vpop.f32.mrf.mxu1 }
 0x1eb   : > { %v1014_v17 = vpop.f32.mrf.mxu3  ;;  %v1027_v18 = vpop.f32.mrf.mxu0 }
 0x1ec   : > { %v1028_v19 = vadd.f32 %v1027_v18, %v829_v16 }
 0x1ed   : > { %v1042_v20 = vpop.f32.mrf.mxu1 }
 0x1ee   : > { %v1041_v21 = vadd.f32 %v1040_v14, %v1028_v19 }
 0x1f0   : > { %v1045_v23 = vmul.f32 0.01, %v1041_v21 }
 0x1f1   : > { %v1001_v24 = vpop.f32.mrf.mxu2 }
 0x1f2   : > { %v1047_v25 = vmax.f32 %v1041_v21, %v1045_v23  ;;  %v1002_v26 = vadd.f32 %v1001_v24, %v828_v22 }
 0x1f3   : > { %v1016_v27 = vpop.f32.mrf.mxu3  ;;  %v1029_v28 = vpop.f32.mrf.mxu0 }
 0x1f4   : > { %v1049_v29 = vpack.c.bf16 %v1047_v25, %v1047_v25  ;;  %v1015_v30 = vadd.f32 %v1014_v17, %v1002_v26 }
 0x1f6   : > { %v1044_v31 = vmul.f32 0.01, %v1015_v30  ;;  %1203 = vmatmul.bf16.vlgmr.msra.gmra.mxu3 %v1049_v29 }
 0x1f8   : > { %v1046_v32 = vmax.f32 %v1015_v30, %v1044_v31 }
 0x1f9   : > { %v1003_v33 = vpop.f32.mrf.mxu2 }
 0x1fa   : > { %v1048_v34 = vpack.c.bf16 %v1046_v32, %v1046_v32 }
 0x1fc   : > { %1190 = vmatmul.bf16.vlgmr.msra.gmra.mxu2 %v1048_v34 }
 0x279   : > { %v1204_v35 = vpop.f32.mrf.mxu3 }
 0x27f   : > { %v1191_v37 = vpop.f32.mrf.mxu2 }
 0x280   : > { %v1192_v38 = vadd.f32 %v1929_v36, %v1191_v37 }
 0x281   : > { %v1206_v39 = vpop.f32.mrf.mxu3 }
 0x282   : > { %v1205_v40 = vadd.f32 %v1204_v35, %v1192_v38 }
 0x284   : > { %1208 = vst [vmem:[%s444_s1] sm:$0xff] %v1205_v40 }
 0x285   : > { %2167 = shalt.err (!%p2164_p9)
}
 0x286   : > { %1844 = dma.vmem_to_hbm [thread:$0]  (%p2377_p4), %s1223_s26, 128, %s1225_s3, %s1210_s16  }
 0x287   : > { %v1193_v41 = vpop.f32.mrf.mxu2 }
 0x288 PF: > { %s1236_s15 = sand.u32 1, %s2206_s30   ;;  %p2501_p10 = scmp.ge.s32.totalorder %s2218_s12, 2 }
 0x289   : > { %s1237_s14 = scalar_lea.sflag [#allocation4], %s1236_s15 }
 0x28a   : > { %p1870_p13 = pnand %p2501_p10, %p2381_p6 }
 0x28c   : > { %p1871_p11 = pneg %p1870_p13 }
 0x28e   : > { %2201 = dma.done.wait (%p1871_p11), %s1237_s14, 128  }
 0x28f   : > { %2203 = vsyncadd (%p1871_p11), %s1237_s14, 4294967168  ;;  %p25_p0 = scmp.ge.s32.totalorder %s2351_s20, 4   ;;  %s2502_s30 = smov %s2210_s10 }
 0x290   : > { %s2503_s10 = smov %s2214_s11  ;;  %s2504_s11 = smov %s2362_s25 }
 0x291   : > { %s2505_s12 = smov %s2351_s20  ;;  %27 = sbr.rel (!%p25_p0) target bundleno = 13 (0xd), region = 125 }
 0x296   :  { %1243 = vsyncpa [#allocation3], 1 }
 0x297   :  { %1245 = vsyncpa [#allocation3 + $0x1], 1 }
 0x298   :  { %1246 = vsyncpa [#allocation6], 1 }
 0x299   :  { %1247 = vsyncpa [#allocation9], 1 }
 0x29a   :  { %1248 = vsyncpa [#allocation12], 1 }
 0x29b   :  { %1249 = vsyncpa [#allocation4], 1 }
 0x29c   :  { %1251 = vsyncpa [#allocation4 + $0x1], 1 }

</bundles_post_ra>
